<compile_context>
chip_gen: v7x
topology: tpu7x:2x2x1
jax: 0.10.0
libtpu: 0.0.40
codegen_flags: <defaults>
</compile_context>

<pallas_src>
import functools

import jax
import jax.numpy as jnp
from jax import lax
from jax.experimental import pallas as pl
from jax.experimental.pallas import tpu as pltpu


def _make_kernel(*, N, tn, ragged, needs_cast, use_arena):
    """Two-phase fused kernel body.  grid = (2, n_blocks), phase axis slowest.

    phase 0: lat += adj_tile^T @ emb_tile   (reduce over N into VMEM scratch)
             [optionally copy adj_tile into a VMEM arena]
    phase 1: out_tile = adj_tile @ lat      (adj from arena or HBM stream)
    """

    def kernel(adj_ref, emb_ref, out_ref, *scratch):
        lat_ref = scratch[0]
        idx = 1
        lat_c_ref = None
        arena_ref = None
        if needs_cast:
            lat_c_ref = scratch[idx]
            idx += 1
        if use_arena:
            arena_ref = scratch[idx]
            idx += 1

        phase = pl.program_id(0)
        n = pl.program_id(1)

        @pl.when((phase == 0) & (n == 0))
        def _():
            lat_ref[...] = jnp.zeros_like(lat_ref)

        @pl.when(phase == 0)
        def _():
            adj_t = adj_ref[...]
            emb_t = emb_ref[...]
            if ragged:
                # Last block extends past N; Pallas does not guarantee zeros
                # for the out-of-range rows, so mask both operands (garbage
                # could be NaN bit patterns; 0*NaN would poison the reduce).
                row = lax.broadcasted_iota(jnp.int32, (tn, 1), 0) + n * tn
                valid = row < N
                adj_t = jnp.where(valid, adj_t, jnp.zeros_like(adj_t))
                emb_t = jnp.where(valid, emb_t, jnp.zeros_like(emb_t))
            if use_arena:
                start = pl.multiple_of(n * tn, tn)
                arena_ref[pl.ds(start, tn), :] = adj_t
            # Contract over the row (N) axis: (tn,H)^T @ (tn,D) -> (H,D).
            # LHS-contracting-dim-0 maps to the MXU transposed-LHS path.
            lat_ref[...] += lax.dot_general(
                adj_t, emb_t,
                dimension_numbers=(((0,), (0,)), ((), ())),
                preferred_element_type=jnp.float32,
            )

        @pl.when(phase == 1)
        def _():
            if needs_cast:
                # Hoisted cast: re-quantize lat once at the phase boundary.
                @pl.when(n == 0)
                def _():
                    lat_c_ref[...] = lat_ref[...].astype(lat_c_ref.dtype)
                lat_in = lat_c_ref[...]
            else:
                lat_in = lat_ref[...]
            if use_arena:
                start = pl.multiple_of(n * tn, tn)
                adj_t = arena_ref[pl.ds(start, tn), :]
            else:
                adj_t = adj_ref[...]
            out_ref[...] = jnp.dot(
                adj_t, lat_in, preferred_element_type=jnp.float32
            ).astype(out_ref.dtype)

    return kernel


@functools.partial(jax.jit, static_argnames=("block_n", "compute_dtype"))
def hgnn_layer(adj, embeds, *, block_n=2048, compute_dtype=None):
    """HGNNLayer forward: adj @ (adj.T @ embeds).

    adj: (N, H) hypergraph incidence, embeds: (N, D) node embeddings.
    compute_dtype=None -> use the (promoted) input dtype directly (no cast,
    exact f32 semantics for f32 inputs). Returns (N, D) float32.
    """
    N, H = adj.shape
    N2, D = embeds.shape
    assert N == N2, "adj and embeds must share the node (row) dimension"

    if compute_dtype is None:
        compute_dtype = jnp.promote_types(adj.dtype, embeds.dtype)
    compute_dtype = jnp.dtype(compute_dtype)
    needs_cast = compute_dtype != jnp.dtype(jnp.float32)

    adj_c = adj if adj.dtype == compute_dtype else adj.astype(compute_dtype)
    emb_c = embeds if embeds.dtype == compute_dtype else embeds.astype(compute_dtype)

    itemsize = compute_dtype.itemsize

    # Generation-aware VMEM budget (128 MiB on v5e/v6e, 64 MiB on v7x).
    try:
        vmem_cap = int(pltpu.get_tpu_info().vmem_capacity_bytes)
    except Exception:
        vmem_cap = 64 * 1024 * 1024  # v7x-safe fallback
    budget = max(int(vmem_cap * 0.75), 32 * 1024 * 1024)

    def _stream_bytes(t):
        return (2 * t * H * itemsize    # adj tile, double-buffered
                + 2 * t * D * itemsize  # embeds tile, double-buffered
                + 2 * t * D * 4)        # f32 output tile, double-buffered

    fixed_bytes = H * D * 4 + (H * D * itemsize if needs_cast else 0)

    # Tile over N only; H and D stay whole inside each block.
    tn = N if N <= block_n else max(8, (block_n // 8) * 8)
    while tn > 8 and _stream_bytes(tn) + fixed_bytes > budget:
        new_tn = max(8, ((tn // 2) // 8) * 8)
        if new_tn == tn:
            break
        tn = new_tn

    n_blocks = -(-N // tn)
    ragged = (N % tn) != 0
    last = n_blocks - 1

    # adj-resident arena fast path: read adj from HBM only once.
    arena_rows = n_blocks * tn
    arena_bytes = arena_rows * H * itemsize
    use_arena = (n_blocks > 1 and
                 _stream_bytes(tn) + fixed_bytes + arena_bytes <= budget)

    needed = _stream_bytes(tn) + fixed_bytes + (arena_bytes if use_arena else 0)
    vmem_limit = int(max(needed + (4 << 20), 32 << 20))
    vmem_limit = int(min(vmem_limit, max(vmem_cap - (2 << 20), 32 << 20)))

    if use_arena:
        # Phase 1 reads adj from the arena; park adj on its last block so no
        # phase-1 HBM fetches are issued.
        adj_spec = pl.BlockSpec((tn, H), lambda p, n: ((1 - p) * n + p * last, 0))
    else:
        adj_spec = pl.BlockSpec((tn, H), lambda p, n: (n, 0))
    # embeds is only consumed in phase 0; park it on its last block in phase 1.
    emb_spec = pl.BlockSpec((tn, D), lambda p, n: ((1 - p) * n + p * last, 0))
    # Output only materializes in phase 1; park on block 0 in phase 0 so the
    # untouched buffer is never written back (index stays 0 across the
    # phase-0 -> phase-1(n=0) boundary).
    out_spec = pl.BlockSpec((tn, D), lambda p, n: (p * n, 0))

    scratch = [pltpu.VMEM((H, D), jnp.float32)]
    if needs_cast:
        scratch.append(pltpu.VMEM((H, D), compute_dtype))
    if use_arena:
        scratch.append(pltpu.VMEM((arena_rows, H), compute_dtype))

    kernel = _make_kernel(N=N, tn=tn, ragged=ragged,
                          needs_cast=needs_cast, use_arena=use_arena)

    out = pl.pallas_call(
        kernel,
        out_shape=jax.ShapeDtypeStruct((N, D), jnp.float32),
        grid_spec=pltpu.PrefetchScalarGridSpec(
            num_scalar_prefetch=0,
            grid=(2, n_blocks),
            in_specs=[adj_spec, emb_spec],
            out_specs=out_spec,
            scratch_shapes=scratch,
        ),
        compiler_params=pltpu.CompilerParams(
            # Both grid axes carry state (lat scratch / output revisit), so
            # they must stay sequential on a single TensorCore.
            dimension_semantics=("arbitrary", "arbitrary"),
            vmem_limit_bytes=vmem_limit,
        ),
    )(adj_c, emb_c)

    return out


if __name__ == "__main__":
    # Shapes consistent with HCCF usage: N nodes, H hyperedges, D latent dim.
    # N is deliberately not a multiple of the small tile to exercise the
    # in-kernel ragged-tail masking.
    N, H, D = 300, 128, 64
    key = jax.random.PRNGKey(0)
    k_adj, k_emb = jax.random.split(key)
    adj = jax.random.normal(k_adj, (N, H), dtype=jnp.float32)
    embeds = jax.random.normal(k_emb, (N, D), dtype=jnp.float32)

    hp = jax.lax.Precision.HIGHEST
    ref = jnp.dot(adj, jnp.dot(adj.T, embeds, precision=hp), precision=hp)

    # 1) Default path: f32 operands (no cast, no pad), single large tile.
    out = hgnn_layer(adj, embeds)
    jax.block_until_ready(out)
    assert out.shape == (N, D)
    assert jnp.allclose(out, ref, atol=1e-2, rtol=1e-3)

    # 2) Multi-block path with a ragged tail (exercises in-kernel masking and
    #    the VMEM-resident adj arena).
    out_mb = hgnn_layer(adj, embeds, block_n=128)
    jax.block_until_ready(out_mb)
    assert out_mb.shape == (N, D)
    assert jnp.allclose(out_mb, ref, atol=1e-2, rtol=1e-3)

    # 3) Opt-in bf16 compute (f32 accumulation), checked against a reference
    #    computed with the same operand rounding.
    out_bf16 = hgnn_layer(adj, embeds, compute_dtype=jnp.bfloat16)
    jax.block_until_ready(out_bf16)
    adj_b = adj.astype(jnp.bfloat16)
    emb_b = embeds.astype(jnp.bfloat16)
    lat_b = jnp.dot(adj_b.T, emb_b, preferred_element_type=jnp.float32)
    ref_b = jnp.dot(adj_b, lat_b.astype(jnp.bfloat16),
                    preferred_element_type=jnp.float32)
    assert jnp.allclose(out_bf16, ref_b, atol=5e-2, rtol=5e-2)

    print("KERNEL_OK")
</pallas_src>

<mosaic_0001>
module attributes {stable_mosaic.version = 11 : i64} {
  func.func @kernel(%arg0: i32, %arg1: i32, %arg2: memref<300x128xf32, #tpu.memory_space<vmem>>, %arg3: memref<300x64xf32, #tpu.memory_space<vmem>>, %arg4: memref<300x64xf32, #tpu.memory_space<vmem>>, %arg5: memref<128x64xf32, #tpu.memory_space<vmem>>) attributes {dimension_semantics = [#tpu.dimension_semantics<arbitrary>, #tpu.dimension_semantics<arbitrary>], iteration_bounds = array<i64: 2, 1>, scalar_prefetch = 0 : i64, scratch_operands = 1 : i64, tpu.core_type = #tpu.core_type<tc>, window_params = [{transform_indices = @transform_0, window_bounds = array<i64: 300, 128>}, {transform_indices = @transform_1, window_bounds = array<i64: 300, 64>}, {transform_indices = @transform_2, window_bounds = array<i64: 300, 64>}]} {
    %c0_i32 = arith.constant 0 : i32
    %0 = arith.cmpi eq, %arg0, %c0_i32 : i32
    %c0_i32_0 = arith.constant 0 : i32
    %1 = arith.cmpi eq, %arg1, %c0_i32_0 : i32
    %2 = arith.andi %0, %1 : i1
    %3 = arith.extui %2 : i1 to i32
    %c0_i32_1 = arith.constant 0 : i32
    %4 = arith.cmpi ne, %3, %c0_i32_1 : i32
    scf.if %4 {
      %cst = arith.constant 0.000000e+00 : f32
      %11 = vector.broadcast %cst : f32 to vector<128x64xf32>
      %c0 = arith.constant 0 : index
      %c0_5 = arith.constant 0 : index
      %12 = vector.load %arg5[%c0, %c0_5] : memref<128x64xf32, #tpu.memory_space<vmem>>, vector<128x64xf32>
      tpu.vector_store %arg5[%c0, %c0_5], %11 {strides = array<i32>} : memref<128x64xf32, #tpu.memory_space<vmem>>, vector<128x64xf32>,
    } else {
    }
    %c0_i32_2 = arith.constant 0 : i32
    %5 = arith.cmpi eq, %arg0, %c0_i32_2 : i32
    %6 = arith.extui %5 : i1 to i32
    %c0_i32_3 = arith.constant 0 : i32
    %7 = arith.cmpi ne, %6, %c0_i32_3 : i32
    scf.if %7 {
      %c0 = arith.constant 0 : index
      %c0_5 = arith.constant 0 : index
      %11 = vector.load %arg2[%c0, %c0_5] : memref<300x128xf32, #tpu.memory_space<vmem>>, vector<300x128xf32>
      %c0_6 = arith.constant 0 : index
      %c0_7 = arith.constant 0 : index
      %12 = vector.load %arg3[%c0_6, %c0_7] : memref<300x64xf32, #tpu.memory_space<vmem>>, vector<300x64xf32>
      %c0_8 = arith.constant 0 : index
      %c0_9 = arith.constant 0 : index
      %13 = vector.load %arg5[%c0_8, %c0_9] : memref<128x64xf32, #tpu.memory_space<vmem>>, vector<128x64xf32>
      %cst = arith.constant dense<0.000000e+00> : vector<128x64xf32>
      %14 = tpu.matmul %11, %12, %cst {dimension_numbers = #tpu.dot_dimension_numbers<[0], [0], [1], [1], [0, 1, 1, 1], [], []>} : vector<300x128xf32>, vector<300x64xf32>, vector<128x64xf32> -> vector<128x64xf32>
      %15 = arith.addf %13, %14 : vector<128x64xf32>
      %c0_10 = arith.constant 0 : index
      %c0_11 = arith.constant 0 : index
      %16 = vector.load %arg5[%c0_10, %c0_11] : memref<128x64xf32, #tpu.memory_space<vmem>>, vector<128x64xf32>
      tpu.vector_store %arg5[%c0_10, %c0_11], %15 {strides = array<i32>} : memref<128x64xf32, #tpu.memory_space<vmem>>, vector<128x64xf32>,
    } else {
    }
    %c1_i32 = arith.constant 1 : i32
    %8 = arith.cmpi eq, %arg0, %c1_i32 : i32
    %9 = arith.extui %8 : i1 to i32
    %c0_i32_4 = arith.constant 0 : i32
    %10 = arith.cmpi ne, %9, %c0_i32_4 : i32
    scf.if %10 {
      %c0 = arith.constant 0 : index
      %c0_5 = arith.constant 0 : index
      %11 = vector.load %arg5[%c0, %c0_5] : memref<128x64xf32, #tpu.memory_space<vmem>>, vector<128x64xf32>
      %c0_6 = arith.constant 0 : index
      %c0_7 = arith.constant 0 : index
      %12 = vector.load %arg2[%c0_6, %c0_7] : memref<300x128xf32, #tpu.memory_space<vmem>>, vector<300x128xf32>
      %cst = arith.constant dense<0.000000e+00> : vector<300x64xf32>
      %13 = tpu.matmul %12, %11, %cst {dimension_numbers = #tpu.dot_dimension_numbers<[1], [0], [0], [1], [0, 0, 1, 1], [], []>} : vector<300x128xf32>, vector<128x64xf32>, vector<300x64xf32> -> vector<300x64xf32>
      %c0_8 = arith.constant 0 : index
      %c0_9 = arith.constant 0 : index
      %14 = vector.load %arg4[%c0_8, %c0_9] : memref<300x64xf32, #tpu.memory_space<vmem>>, vector<300x64xf32>
      tpu.vector_store %arg4[%c0_8, %c0_9], %13 {strides = array<i32>} : memref<300x64xf32, #tpu.memory_space<vmem>>, vector<300x64xf32>,
    } else {
    }
    return
  }
  func.func @transform_0(%arg0: i32, %arg1: i32) -> (i32, i32) {
    %c0_i32 = arith.constant 0 : i32
    %c0_i32_0 = arith.constant 0 : i32
    return %arg1, %c0_i32 : i32, i32
  }
  func.func @transform_1(%arg0: i32, %arg1: i32) -> (i32, i32) {
    %c1_i32 = arith.constant 1 : i32
    %0 = arith.subi %c1_i32, %arg0 : i32
    %1 = arith.muli %0, %arg1 : i32
    %c0_i32 = arith.constant 0 : i32
    %2 = arith.muli %arg0, %c0_i32 : i32
    %3 = arith.addi %1, %2 : i32
    %c0_i32_0 = arith.constant 0 : i32
    %c0_i32_1 = arith.constant 0 : i32
    return %3, %c0_i32_0 : i32, i32
  }
  func.func @transform_2(%arg0: i32, %arg1: i32) -> (i32, i32) {
    %0 = arith.muli %arg0, %arg1 : i32
    %c0_i32 = arith.constant 0 : i32
    %c0_i32_0 = arith.constant 0 : i32
    return %0, %c0_i32 : i32, i32
  }
}

</mosaic_0001>

<bundles_post_ra>
// kernel: hgnn_layer.1
= control target key start
LH: loop header
LB: loop body
LE: loop exit
PB: predicated region body
PF: predicated region fallthrough
CT: control target
= control target key end

     0   :  { %s1829_s9 = smov 0   ;;  %s1831_s10 = smov 0   ;;  %s2448_s0 = inlined_call_operand.vmem [shape: f32[300,128], index: 0, kind: input, shape index: {}]   ;;  %s2449_s1 = inlined_call_operand.vmem [shape: f32[300,64], index: 1, kind: input, shape index: {}]   ;;  %s2450_s2 = inlined_call_operand.vmem [shape: f32[300,64], index: 2, kind: output, shape index: {}]  }
   0x1   :  { %s1833_s11 = smov 0  }
   0x2 LB: > { %s24_s12 = sadd.s32 1, %s1806_s10  ;;  %p1232_p0 = scmp.ge.s32.totalorder %s1810_s11, 1  ;;  %s1810_s11 = sphi %s1833_s11, %s12_s11   ;;  %s1806_s10 = sphi %s1831_s10, %s2452_s10   ;;  %s1802_s9 = sphi %s1829_s9, %s2451_s9  }
   0x3   : > { %p26_p1 = scmp.ge.s32.totalorder %s24_s12, 2  ;;  %p146_p2 = scmp.lt.s32.totalorder %s1810_s11, 3 }
   0x5   : > { %s2454_s12 = smov (%p26_p1, %s24_s12), 0  ;;  %p147_p3 = pnand %p1232_p0, %p146_p2 }
   0x6   : > { %p200_p4 = scmp.eq.s32.totalorder (!%p147_p3), %s1802_s9, 0 }
   0x7   : > { %150 = sbr.rel (%p147_p3) target bundleno = 756 (0x2f4), region = 28 }
   0xe   : > { %205 = sbr.rel (!%p200_p4) target bundleno = 23 (0x17), region = 32  ;;  %vm206_vm0 = vcmask (%p200_p4), 523264   ;;  %v1812_v0 = vmov (%p200_p4), 0.0  }
   0xf   : > { %207 = vst.msk [vmem:[#allocation2] sm:$0xff] (%p200_p4), %vm206_vm0, %v1812_v0  ;;  %208 = vst.msk [vmem:[#allocation2 + $0x8] sm:$0xff] (%p200_p4), %vm206_vm0, %v1812_v0 }
  0x10   : > { %209 = vst.msk [vmem:[#allocation2 + $0x10] sm:$0xff] (%p200_p4), %vm206_vm0, %v1812_v0  ;;  %210 = vst.msk [vmem:[#allocation2 + $0x18] sm:$0xff] (%p200_p4), %vm206_vm0, %v1812_v0 }
  0x11   : > { %211 = vst.msk [vmem:[#allocation2 + $0x20] sm:$0xff] (%p200_p4), %vm206_vm0, %v1812_v0  ;;  %212 = vst.msk [vmem:[#allocation2 + $0x28] sm:$0xff] (%p200_p4), %vm206_vm0, %v1812_v0 }
  0x12   : > { %213 = vst.msk [vmem:[#allocation2 + $0x30] sm:$0xff] (%p200_p4), %vm206_vm0, %v1812_v0  ;;  %214 = vst.msk [vmem:[#allocation2 + $0x38] sm:$0xff] (%p200_p4), %vm206_vm0, %v1812_v0 }
  0x13   : > { %215 = vst.msk [vmem:[#allocation2 + $0x40] sm:$0xff] (%p200_p4), %vm206_vm0, %v1812_v0  ;;  %216 = vst.msk [vmem:[#allocation2 + $0x48] sm:$0xff] (%p200_p4), %vm206_vm0, %v1812_v0 }
  0x14   : > { %217 = vst.msk [vmem:[#allocation2 + $0x50] sm:$0xff] (%p200_p4), %vm206_vm0, %v1812_v0  ;;  %218 = vst.msk [vmem:[#allocation2 + $0x58] sm:$0xff] (%p200_p4), %vm206_vm0, %v1812_v0 }
  0x15   : > { %219 = vst.msk [vmem:[#allocation2 + $0x60] sm:$0xff] %vm206_vm0, %v1812_v0  ;;  %220 = vst.msk [vmem:[#allocation2 + $0x68] sm:$0xff] %vm206_vm0, %v1812_v0 }
  0x16   : > { %221 = vst.msk [vmem:[#allocation2 + $0x70] sm:$0xff] %vm206_vm0, %v1812_v0  ;;  %222 = vst.msk [vmem:[#allocation2 + $0x78] sm:$0xff] %vm206_vm0, %v1812_v0 }
  0x17 PF: > { %p1234_p5 = scmp.ne.s32.totalorder %s1802_s9, 0 }
  0x18   : > { %v226_v1 = vld [vmem:[%s2448_s0] sm:$0xff] (!%p1234_p5)  ;;  %v227_v3 = vld [vmem:[%s2448_s0 + $0x8] sm:$0xff] (!%p1234_p5)  ;;  %v228_v7 = vld [vmem:[%s2448_s0 + $0x10] sm:$0xff] (!%p1234_p5)  ;;  %vm463_vm1 = vcmask (!%p1234_p5), 1043456   ;;  %vm1813_vm2 = vmmov (!%p1234_p5), 1   ;;  %vm414_vm4 = vcmask (!%p1234_p5), 359424  }
  0x19   : > { %225 = sbr.rel (%p1234_p5) target bundleno = 470 (0x1d6), region = 36  ;;  %v242_v2 = vld [vmem:[%s2448_s0 + $0x80] sm:$0xff] (!%p1234_p5)  ;;  %v243_v5 = vld [vmem:[%s2448_s0 + $0x88] sm:$0xff] (!%p1234_p5)  ;;  %v244_v8 = vld [vmem:[%s2448_s0 + $0x90] sm:$0xff] (!%p1234_p5)  ;;  %vm773_vm5 = vcmask (!%p1234_p5), 523264  }
  0x1a   : > { %v1676_v4 = vpack.i.bf16 (!%p1234_p5), %v226_v1, %v242_v2  ;;  %v1678_v6 = vpack.i.bf16 (!%p1234_p5), %v227_v3, %v243_v5  ;;  %v258_v9 = vld [vmem:[%s2448_s0 + $0x100] sm:$0xff] (!%p1234_p5)  ;;  %v1680_v10 = vpack.i.bf16 (!%p1234_p5), %v228_v7, %v244_v8  ;;  %v229_v11 = vld [vmem:[%s2448_s0 + $0x18] sm:$0xff] (!%p1234_p5)  ;;  %v259_v13 = vld [vmem:[%s2448_s0 + $0x108] sm:$0xff] (!%p1234_p5) }
  0x1b   : > { %382 = vxpose.xlu1.b32.start [1/6] (short) (!%p1234_p5), %v258_v9, 128  ;;  %v245_v12 = vld [vmem:[%s2448_s0 + $0x98] sm:$0xff] (!%p1234_p5)  ;;  %v230_v15 = vld [vmem:[%s2448_s0 + $0x20] sm:$0xff] (!%p1234_p5)  ;;  %v260_v17 = vld [vmem:[%s2448_s0 + $0x110] sm:$0xff] (!%p1234_p5) }
  0x1c   : > { %1677 = vxpose.xlu0.b32.start [1/16] (!%p1234_p5), %v1676_v4, 128  ;;  %v1682_v14 = vpack.i.bf16 (!%p1234_p5), %v229_v11, %v245_v12  ;;  %v246_v16 = vld [vmem:[%s2448_s0 + $0xa0] sm:$0xff] (!%p1234_p5)  ;;  %v281_v19 = vld [vmem:[%s2449_s1 + $0x88] sm:$0xff] (!%p1234_p5)  ;;  %v282_v24 = vld [vmem:[%s2449_s1 + $0x90] sm:$0xff] (!%p1234_p5) }
  0x1d   : > { %v280_v18 = vld [vmem:[%s2449_s1 + $0x80] sm:$0xff] (!%p1234_p5)  ;;  %v265_v21 = vld [vmem:[%s2449_s1 + $0x8] sm:$0xff] (!%p1234_p5)  ;;  %v283_v25 = vld [vmem:[%s2449_s1 + $0x98] sm:$0xff] (!%p1234_p5)  ;;  %v1684_v27 = vpack.i.bf16 (!%p1234_p5), %v230_v15, %v246_v16 }
  0x1e   : > { %v264_v20 = vld [vmem:[%s2449_s1] sm:$0xff] (!%p1234_p5)  ;;  %v1539_v22 = vpack.c.bf16 (!%p1234_p5), %v281_v19, %v280_v18  ;;  %v266_v26 = vld [vmem:[%s2449_s1 + $0x10] sm:$0xff] (!%p1234_p5)  ;;  %v1543_v28 = vpack.c.bf16 (!%p1234_p5), %v283_v25, %v282_v24  ;;  %v267_v29 = vld [vmem:[%s2449_s1 + $0x18] sm:$0xff] (!%p1234_p5) }
  0x1f   : > { %383 = vxpose.xlu1.b32.cont [2/6] (short) (!%p1234_p5), %v259_v13, 128  ;;  %v1541_v23 = vpack.c.bf16 (!%p1234_p5), %v265_v21, %v264_v20  ;;  %v284_v30 = vld [vmem:[%s2449_s1 + $0xa0] sm:$0xff] (!%p1234_p5)  ;;  %v285_v31 = vld [vmem:[%s2449_s1 + $0xa8] sm:$0xff] (!%p1234_p5)  ;;  %v261_v34 = vld [vmem:[%s2448_s0 + $0x118] sm:$0xff] (!%p1234_p5)  ;;  %v1545_v35 = vpack.c.bf16 (!%p1234_p5), %v267_v29, %v266_v26 }
  0x20   : > { %1679 = vxpose.xlu0.b32.cont [2/16] %v1678_v6, 128  ;;  %v231_v32 = vld [vmem:[%s2448_s0 + $0x28] sm:$0xff]  ;;  %1540 = vmatprep.subr.bf16.mxu0 %v1539_v22  ;;  %v1547_v36 = vpack.c.bf16 %v285_v31, %v284_v30  ;;  %v268_v37 = vld [vmem:[%s2449_s1 + $0x20] sm:$0xff]  ;;  %v286_v40 = vld [vmem:[%s2449_s1 + $0xb0] sm:$0xff] }
  0x21   : > { %v247_v33 = vld [vmem:[%s2448_s0 + $0xa8] sm:$0xff]  ;;  %1617 = vmatprep.subr.bf16.mxu1 %v1539_v22  ;;  %1542 = vmatpush3.bf16.msra.mxu0 %v1541_v23  ;;  %v287_v41 = vld [vmem:[%s2449_s1 + $0xb8] sm:$0xff]  ;;  %v232_v42 = vld [vmem:[%s2448_s0 + $0x30] sm:$0xff] }
  0x22   : > { %1625 = vmatpush3.bf16.msra.mxu1 %v1541_v23  ;;  %1544 = vmatprep.subr.bf16.mxu0 %v1543_v28  ;;  %v269_v38 = vld [vmem:[%s2449_s1 + $0x28] sm:$0xff]  ;;  %v1686_v39 = vpack.i.bf16 %v231_v32, %v247_v33  ;;  %v248_v43 = vld [vmem:[%s2448_s0 + $0xb0] sm:$0xff]  ;;  %v262_v44 = vld [vmem:[%s2448_s0 + $0x120] sm:$0xff]  ;;  %v1551_v46 = vpack.c.bf16 %v287_v41, %v286_v40 }
  0x23   : > { %384 = vxpose.xlu1.b32.cont [3/6] (short) %v260_v17, 128  ;;  %1618 = vmatprep.subr.bf16.mxu1 %v1543_v28  ;;  %v1549_v45 = vpack.c.bf16 %v269_v38, %v268_v37  ;;  %v270_v47 = vld [vmem:[%s2449_s1 + $0x30] sm:$0xff]  ;;  %v271_v48 = vld [vmem:[%s2449_s1 + $0x38] sm:$0xff]  ;;  %v1688_v49 = vpack.i.bf16 %v232_v42, %v248_v43  ;;  %v288_v50 = vld [vmem:[%s2449_s1 + $0xc0] sm:$0xff] }
  0x24   : > { %1681 = vxpose.xlu0.b32.cont [3/16] %v1680_v10, 128  ;;  %v289_v51 = vld [vmem:[%s2449_s1 + $0xc8] sm:$0xff]  ;;  %v233_v52 = vld [vmem:[%s2448_s0 + $0x38] sm:$0xff]  ;;  %v1553_v55 = vpack.c.bf16 %v271_v48, %v270_v47  ;;  %v272_v57 = vld [vmem:[%s2449_s1 + $0x40] sm:$0xff] }
  0x25   : > { %1546 = vmatpush3.bf16.msra.mxu0 %v1545_v35  ;;  %v249_v53 = vld [vmem:[%s2448_s0 + $0xb8] sm:$0xff]  ;;  %v263_v54 = vld [vmem:[%s2448_s0 + $0x128] sm:$0xf]  ;;  %v1555_v56 = vpack.c.bf16 %v289_v51, %v288_v50  ;;  %v290_v60 = vld [vmem:[%s2449_s1 + $0xd0] sm:$0xff] }
  0x26   : > { %1626 = vmatpush3.bf16.msra.mxu1 %v1545_v35  ;;  %1548 = vmatprep.subr.bf16.mxu0 %v1547_v36  ;;  %v273_v58 = vld [vmem:[%s2449_s1 + $0x48] sm:$0xff]  ;;  %v1690_v59 = vpack.i.bf16 %v233_v52, %v249_v53  ;;  %v291_v61 = vld [vmem:[%s2449_s1 + $0xd8] sm:$0xff]  ;;  %v234_v62 = vld [vmem:[%s2448_s0 + $0x40] sm:$0xff] }
  0x27   : > { %385 = vxpose.xlu1.b32.cont [4/6] (short) %v261_v34, 128  ;;  %1619 = vmatprep.subr.bf16.mxu1 %v1547_v36  ;;  %v250_v63 = vld [vmem:[%s2448_s0 + $0xc0] sm:$0xff]  ;;  %v1557_v0 = vpack.c.bf16 %v273_v58, %v272_v57  ;;  %v1559_v1 = vpack.c.bf16 %v291_v61, %v290_v60  ;;  %v274_v2 = vld [vmem:[%s2449_s1 + $0x50] sm:$0xff]  ;;  %v275_v3 = vld [vmem:[%s2449_s1 + $0x58] sm:$0xff] }
  0x28   : > { %1683 = vxpose.xlu0.b32.cont [4/16] %v1682_v14, 128  ;;  %v1692_v4 = vpack.i.bf16 %v234_v62, %v250_v63  ;;  %v292_v5 = vld [vmem:[%s2449_s1 + $0xe0] sm:$0xff]  ;;  %v293_v6 = vld [vmem:[%s2449_s1 + $0xe8] sm:$0xff]  ;;  %v1561_v9 = vpack.c.bf16 %v275_v3, %v274_v2  ;;  %v294_v14 = vld [vmem:[%s2449_s1 + $0xf0] sm:$0xff] }
  0x29   : > { %1550 = vmatpush3.bf16.msra.mxu0 %v1549_v45  ;;  %v235_v7 = vld [vmem:[%s2448_s0 + $0x48] sm:$0xff]  ;;  %v1563_v10 = vpack.c.bf16 %v293_v6, %v292_v5  ;;  %v276_v11 = vld [vmem:[%s2449_s1 + $0x60] sm:$0xff]  ;;  %v295_v15 = vld [vmem:[%s2449_s1 + $0xf8] sm:$0xff] }
  0x2a   : > { %1627 = vmatpush3.bf16.msra.mxu1 %v1549_v45  ;;  %1552 = vmatprep.subr.bf16.mxu0 %v1551_v46  ;;  %v251_v8 = vld [vmem:[%s2448_s0 + $0xc8] sm:$0xff]  ;;  %v236_v16 = vld [vmem:[%s2448_s0 + $0x50] sm:$0xff]  ;;  %v1567_v19 = vpack.c.bf16 %v295_v15, %v294_v14  ;;  %v279_v21 = vld [vmem:[%s2449_s1 + $0x78] sm:$0xff] }
  0x2b   : > { %386 = vxpose.xlu1.b32.cont [5/6] (short) %v262_v44, 128  ;;  %1620 = vmatprep.subr.bf16.mxu1 %v1551_v46  ;;  %v277_v12 = vld [vmem:[%s2449_s1 + $0x68] sm:$0xff]  ;;  %v1694_v13 = vpack.i.bf16 %v235_v7, %v251_v8  ;;  %v252_v17 = vld [vmem:[%s2448_s0 + $0xd0] sm:$0xff]  ;;  %v237_v23 = vld [vmem:[%s2448_s0 + $0x58] sm:$0xff] }
  0x2c   : > { %1685 = vxpose.xlu0.b32.cont [5/16] %v1684_v27, 128  ;;  %v1565_v18 = vpack.c.bf16 %v277_v12, %v276_v11  ;;  %v278_v20 = vld [vmem:[%s2449_s1 + $0x70] sm:$0xff]  ;;  %v1696_v22 = vpack.i.bf16 %v236_v16, %v252_v17  ;;  %v253_v24 = vld [vmem:[%s2448_s0 + $0xd8] sm:$0xff]  ;;  %v238_v27 = vld [vmem:[%s2448_s0 + $0x60] sm:$0xff] }
  0x2d   : > { %1554 = vmatpush3.bf16.msra.mxu0 %v1553_v55  ;;  %v1569_v25 = vpack.c.bf16 %v279_v21, %v278_v20  ;;  %v1698_v26 = vpack.i.bf16 %v237_v23, %v253_v24  ;;  %v254_v28 = vld [vmem:[%s2448_s0 + $0xe0] sm:$0xff]  ;;  %v239_v30 = vld [vmem:[%s2448_s0 + $0x68] sm:$0xff]  ;;  %v240_v33 = vld [vmem:[%s2448_s0 + $0x70] sm:$0xff] }
  0x2e   : > { %1628 = vmatpush3.bf16.msra.mxu1 %v1553_v55  ;;  %1556 = vmatprep.subr.bf16.mxu0 %v1555_v56  ;;  %v1700_v29 = vpack.i.bf16 %v238_v27, %v254_v28  ;;  %v255_v31 = vld [vmem:[%s2448_s0 + $0xe8] sm:$0xff]  ;;  %v256_v34 = vld [vmem:[%s2448_s0 + $0xf0] sm:$0xff]  ;;  %v296_v35 = vld [vmem:[%s2449_s1 + $0x100] sm:$0xff] }
  0x2f   : > { %387 = vxpose.xlu1.b32.end [6/6] (short) %v263_v54, 128  ;;  %1621 = vmatprep.subr.bf16.mxu1 %v1555_v56  ;;  %v1702_v32 = vpack.i.bf16 %v239_v30, %v255_v31  ;;  %v297_v36 = vld [vmem:[%s2449_s1 + $0x108] sm:$0xff]  ;;  %v1704_v38 = vpack.i.bf16 %v240_v33, %v256_v34  ;;  %v257_v40 = vld [vmem:[%s2448_s0 + $0xf8] sm:$0xff]  ;;  %v300_v28 = vld [vmem:[%s2449_s1 + $0x120] sm:$0xff] }
  0x30   : > { %1687 = vxpose.xlu0.b32.cont [6/16] %v1686_v39, 128  ;;  %v2077_v37 = vpack.c.bf16 %v297_v36, %v296_v35  ;;  %v241_v39 = vld [vmem:[%s2448_s0 + $0x78] sm:$0xff]  ;;  %vm1580_vm3 = vmpackc.low %vm463_vm1, %vm1813_vm2 }
  0x31   : > { %1558 = vmatpush3.bf16.msra.mxu0 %v1557_v0  ;;  %v1706_v41 = vpack.i.bf16 %v241_v39, %v257_v40  ;;  %v299_v23 = vld [vmem:[%s2449_s1 + $0x118] sm:$0xff] }
  0x32   : > { %1629 = vmatpush3.bf16.msra.mxu1 %v1557_v0  ;;  %1560 = vmatprep.subr.bf16.mxu0 %v1559_v1 }
  0x33   : > { %1622 = vmatprep.subr.bf16.mxu1 %v1559_v1 }
  0x34   : > { %1689 = vxpose.xlu0.b32.cont [7/16] %v1688_v49, 128 }
  0x35   : > { %1562 = vmatpush3.bf16.msra.mxu0 %v1561_v9 }
  0x36   : > { %1630 = vmatpush3.bf16.msra.mxu1 %v1561_v9  ;;  %1564 = vmatprep.subr.bf16.mxu0 %v1563_v10 }
  0x37   : > { %1623 = vmatprep.subr.bf16.mxu1 %v1563_v10 }
  0x38   : > { %1691 = vxpose.xlu0.b32.cont [8/16] %v1690_v59, 128 }
  0x39   : > { %1566 = vmatpush3.bf16.msra.mxu0 %v1565_v18 }
  0x3a   : > { %1631 = vmatpush3.bf16.msra.mxu1 %v1565_v18  ;;  %1568 = vmatprep.subr.bf16.mxu0 %v1567_v19 }
  0x3b   : > { %1624 = vmatprep.subr.bf16.mxu1 %v1567_v19 }
  0x3c   : > { %1693 = vxpose.xlu0.b32.cont [9/16] %v1692_v4, 128 }
  0x3d   : > { %1570 = vmatpush3.bf16.msra.mxu0 %v1569_v25 }
  0x3e   : > { %1632 = vmatpush3.bf16.msra.mxu1 %v1569_v25 }
  0x3f   : > { %1572 = vmatprep.subr.bf16.mxu1 %v2077_v37 }
  0x40   : > { %1695 = vxpose.xlu0.b32.cont [10/16] %v1694_v13, 128 }
  0x44   : > { %1697 = vxpose.xlu0.b32.cont [11/16] %v1696_v22, 128  ;;  %v298_v22 = vld [vmem:[%s2449_s1 + $0x110] sm:$0xff] }
  0x45   : > { %v1575_v27 = vpack.c.bf16 %v299_v23, %v298_v22 }
  0x48   : > { %1699 = vxpose.xlu0.b32.cont [12/16] %v1698_v26, 128 }
  0x4c   : > { %1701 = vxpose.xlu0.b32.cont [13/16] %v1700_v29, 128  ;;  %v301_v29 = vld [vmem:[%s2449_s1 + $0x128] sm:$0xf] }
  0x4d   : > { %v1579_v34 = vpack.c.bf16 %v301_v29, %v300_v28 }
  0x50   : > { %1703 = vxpose.xlu0.b32.cont [14/16] %v1702_v32, 128 }
  0x54   : > { %1705 = vxpose.xlu0.b32.cont [15/16] %v1704_v38, 128 }
  0x58   : > { %1707 = vxpose.xlu0.b32.end [16/16] %v1706_v41, 128 }
  0x9b   : > { %v2086_v46 = vpop.trf.xlu1 }
  0x9c   : > { %v1708_v42 = vpop.trf.xlu0 }
  0x9d   : > { %v1709_v43 = vunpack.i.l.bf16 %v1708_v42  ;;  %v1712_v44 = vunpack.i.h.bf16 %v1708_v42 }
  0x9f   : > { %531 = vmatprep.mubr.f32.mxu0 %v1709_v43  ;;  %v2088_v52 = vpop.trf.xlu1 }
  0xa0   : > { %v1713_v45 = vpop.trf.xlu0  ;;  %532 = vmatmul.mubr.f32.vlgmr.msra.gmra.mrb[0].mxu0 %v1712_v44 }
  0xa1   : > { %v1714_v47 = vunpack.i.l.bf16 %v1713_v45  ;;  %v1717_v48 = vunpack.i.h.bf16 %v1713_v45 }
  0xa3   : > { %536 = vmatprep.mubr.f32.mxu0 %v1714_v47  ;;  %v2090_v56 = vpop.trf.xlu1 }
  0xa4   : > { %v1718_v49 = vpop.trf.xlu0  ;;  %537 = vmatmul.mubr.f32.gmra.mrb[2].mxu0 %v1717_v48 }
  0xa5   : > { %v1719_v50 = vunpack.i.l.bf16 %v1718_v49  ;;  %v1722_v51 = vunpack.i.h.bf16 %v1718_v49 }
  0xa7   : > { %541 = vmatprep.mubr.f32.mxu0 %v1719_v50  ;;  %v2092_v63 = vpop.trf.xlu1 }
  0xa8   : > { %v1723_v53 = vpop.trf.xlu0  ;;  %542 = vmatmul.mubr.f32.gmra.mrb[4].mxu0 %v1722_v51 }
  0xa9   : > { %v1724_v54 = vunpack.i.l.bf16 %v1723_v53  ;;  %v1727_v55 = vunpack.i.h.bf16 %v1723_v53 }
  0xab   : > { %546 = vmatprep.mubr.f32.mxu0 %v1724_v54  ;;  %v2094_v3 = vpop.trf.xlu1 }
  0xac   : > { %v1728_v57 = vpop.trf.xlu0  ;;  %547 = vmatmul.mubr.f32.gmra.mrb[6].mxu0 %v1727_v55 }
  0xad   : > { %v1729_v58 = vunpack.i.l.bf16 %v1728_v57  ;;  %v1732_v59 = vunpack.i.h.bf16 %v1728_v57 }
  0xaf   : > { %551 = vmatprep.mubr.f32.mxu0 %v1729_v58  ;;  %v2096_v10 = vpop.trf.xlu1 }
  0xb0   : > { %v1733_v60 = vpop.trf.xlu0  ;;  %552 = vmatmul.mubr.f32.gmra.mrb[8].mxu0 %v1732_v59 }
  0xb1   : > { %v1734_v61 = vunpack.i.l.bf16 %v1733_v60  ;;  %v1737_v62 = vunpack.i.h.bf16 %v1733_v60 }
  0xb3   : > { %556 = vmatprep.mubr.f32.mxu0 %v1734_v61  ;;  %v404_v14 = vpop.trf.xlu1 }
  0xb4   : > { %v1738_v0 = vpop.trf.xlu0  ;;  %557 = vmatmul.mubr.f32.gmra.mrb[10].mxu0 %v1737_v62 }
  0xb5   : > { %v1739_v1 = vunpack.i.l.bf16 %v1738_v0  ;;  %v1742_v2 = vunpack.i.h.bf16 %v1738_v0 }
  0xb7   : > { %561 = vmatprep.mubr.f32.mxu0 %v1739_v1  ;;  %v405_v21 = vpop.trf.xlu1 }
  0xb8   : > { %v1743_v4 = vpop.trf.xlu0  ;;  %562 = vmatmul.mubr.f32.gmra.mrb[12].mxu0 %v1742_v2 }
  0xb9   : > { %v1744_v5 = vunpack.i.l.bf16 %v1743_v4  ;;  %v1747_v6 = vunpack.i.h.bf16 %v1743_v4 }
  0xbb   : > { %566 = vmatprep.mubr.f32.mxu0 %v1744_v5  ;;  %v406_v30 = vpop.trf.xlu1 }
  0xbc   : > { %v1748_v7 = vpop.trf.xlu0  ;;  %567 = vmatmul.mubr.f32.gmra.mrb[14].mxu0 %v1747_v6 }
  0xbd   : > { %v1749_v8 = vunpack.i.l.bf16 %v1748_v7  ;;  %v1752_v9 = vunpack.i.h.bf16 %v1748_v7 }
  0xbf   : > { %571 = vmatprep.mubr.f32.mxu0 %v1749_v8  ;;  %v407_v39 = vpop.trf.xlu1 }
  0xc0   : > { %v1753_v11 = vpop.trf.xlu0  ;;  %572 = vmatmul.mubr.f32.gmra.mrb[16].mxu0 %v1752_v9 }
  0xc1   : > { %v1754_v12 = vunpack.i.l.bf16 %v1753_v11  ;;  %v1757_v13 = vunpack.i.h.bf16 %v1753_v11 }
  0xc3   : > { %576 = vmatprep.mubr.f32.mxu0 %v1754_v12 }
  0xc4   : > { %v1758_v15 = vpop.trf.xlu0  ;;  %577 = vmatmul.mubr.f32.gmra.mrb[18].mxu0 %v1757_v13 }
  0xc5   : > { %v1759_v16 = vunpack.i.l.bf16 %v1758_v15  ;;  %v1762_v17 = vunpack.i.h.bf16 %v1758_v15 }
  0xc7   : > { %581 = vmatprep.mubr.f32.mxu0 %v1759_v16 }
  0xc8   : > { %v1763_v18 = vpop.trf.xlu0  ;;  %582 = vmatmul.mubr.f32.gmra.mrb[20].mxu0 %v1762_v17 }
  0xc9   : > { %v1764_v19 = vunpack.i.l.bf16 %v1763_v18  ;;  %v1767_v20 = vunpack.i.h.bf16 %v1763_v18 }
  0xcb   : > { %586 = vmatprep.mubr.f32.mxu0 %v1764_v19 }
  0xcc   : > { %v1768_v24 = vpop.trf.xlu0  ;;  %587 = vmatmul.mubr.f32.gmra.mrb[22].mxu0 %v1767_v20 }
  0xcd   : > { %v1769_v25 = vunpack.i.l.bf16 %v1768_v24  ;;  %v1772_v26 = vunpack.i.h.bf16 %v1768_v24 }
  0xcf   : > { %591 = vmatprep.mubr.f32.mxu1 %v1769_v25 }
  0xd0   : > { %v1773_v31 = vpop.trf.xlu0  ;;  %592 = vmatmul.mubr.f32.vlgmr.msra.gmra.mrb[0].mxu1 %v1772_v26 }
  0xd1   : > { %1574 = vmatpush3.bf16.msra.mxu1 %v2077_v37  ;;  %v1774_v32 = vunpack.i.l.bf16 %v1773_v31  ;;  %v1777_v33 = vunpack.i.h.bf16 %v1773_v31  ;;  %v408_v37 = vpop.trf.xlu1 }
  0xd2   : > { %1576 = vmatprep.subr.bf16.mxu1 %v1575_v27 }
  0xd3   : > { %596 = vmatprep.mubr.f32.mxu1 %v1774_v32  ;;  %v303_v32 = vld [vmem:[#allocation2 + $0x8] sm:$0xff] }
  0xd4   : > { %v1778_v35 = vpop.trf.xlu0  ;;  %597 = vmatmul.mubr.f32.gmra.mrb[2].mxu1 %v1777_v33 }
  0xd5   : > { %1578 = vmatpush3.bf16.msra.mxu1 %v1575_v27  ;;  %v1779_v36 = vunpack.i.l.bf16 %v1778_v35  ;;  %v1782_v38 = vunpack.i.h.bf16 %v1778_v35  ;;  %v409_v43 = vpop.trf.xlu1  ;;  %v302_v35 = vld [vmem:[#allocation2] sm:$0xff] }
  0xd6   : > { %1581 = vmatprep.subr.msk.bf16.mxu1 %vm1580_vm3, %v1579_v34 }
  0xd7   : > { %601 = vmatprep.mubr.f32.mxu1 %v1779_v36 }
  0xd8   : > { %v1783_v40 = vpop.trf.xlu0  ;;  %602 = vmatmul.mubr.f32.gmra.mrb[4].mxu1 %v1782_v38 }
  0xd9   : > { %v1787_v41 = vunpack.i.h.bf16 %v1783_v40  ;;  %v1784_v42 = vunpack.i.l.bf16 %v1783_v40  ;;  %1584 = vmatpush3.bf16.msk.msra.mxu1 %vm1580_vm3, %v1579_v34  ;;  %v410_v44 = vpop.trf.xlu1 }
  0xdb   : > { %606 = vmatprep.mubr.f32.mxu1 %v1784_v42 }
  0xdc   : > { %607 = vmatmul.mubr.f32.gmra.mrb[6].mxu1 %v1787_v41  ;;  %v305_v41 = vld [vmem:[#allocation2 + $0x18] sm:$0xff] }
  0xdd   : > { %1426 = vmatprep.mubr.msk.f32.mxu1 %vm414_vm4, %v2086_v46  ;;  %v411_v45 = vpop.trf.xlu1 }
  0xe0   : > { %1427 = vmatmul.mubr.msk.f32.vlgmr.msra.gmra.mrb[8].mxu1 %vm414_vm4, %v2088_v52 }
  0xe1   : > { %1429 = vmatprep.mubr.msk.f32.mxu1 %vm414_vm4, %v2090_v56  ;;  %v412_v46 = vpop.trf.xlu1 }
  0xe4   : > { %1430 = vmatmul.mubr.msk.f32.gmra.mrb[10].mxu1 %vm414_vm4, %v2092_v63 }
  0xe5   : > { %1432 = vmatprep.mubr.msk.f32.mxu1 %vm414_vm4, %v2094_v3  ;;  %v413_v47 = vpop.trf.xlu1 }
  0xe8   : > { %1433 = vmatmul.mubr.msk.f32.gmra.mrb[12].mxu1 %vm414_vm4, %v2096_v10 }
  0xe9   : > { %1435 = vmatprep.mubr.msk.f32.mxu1 %vm414_vm4, %v404_v14 }
  0xec   : > { %1436 = vmatmul.mubr.msk.f32.gmra.mrb[14].mxu1 %vm414_vm4, %v405_v21 }
  0xed   : > { %1438 = vmatprep.mubr.msk.f32.mxu1 %vm414_vm4, %v406_v30 }
  0xf0   : > { %1439 = vmatmul.mubr.msk.f32.gmra.mrb[16].mxu1 %vm414_vm4, %v407_v39 }
  0xf1   : > { %1441 = vmatprep.mubr.msk.f32.mxu1 %vm414_vm4, %v408_v37 }
  0xf4   : > { %1442 = vmatmul.mubr.msk.f32.gmra.mrb[18].mxu1 %vm414_vm4, %v409_v43  ;;  %v304_v43 = vld [vmem:[#allocation2 + $0x10] sm:$0xff] }
  0xf5   : > { %1444 = vmatprep.mubr.msk.f32.mxu1 %vm414_vm4, %v410_v44 }
  0xf8   : > { %1445 = vmatmul.mubr.msk.f32.gmra.mrb[20].mxu1 %vm414_vm4, %v411_v45 }
  0xf9   : > { %1447 = vmatprep.mubr.msk.f32.mxu1 %vm414_vm4, %v412_v46 }
  0xfc   : > { %1448 = vmatmul.mubr.msk.f32.gmra.mrb[22].mxu1 %vm414_vm4, %v413_v47 }
 0x173   : > { %v1290_v48 = vpop.f32.mrb[0].mxu0 }
 0x174   : > { %v1291_v49 = vpop.f32.mrb[1].mxu0 }
 0x175   : > { %v1292_v50 = vadd.f32 %v1291_v49, %v1290_v48  ;;  %v307_v48 = vld [vmem:[#allocation2 + $0x28] sm:$0xff] }
 0x177   : > { %v1293_v51 = vpop.f32.mrb[2].mxu0 }
 0x178   : > { %v1294_v52 = vpop.f32.mrb[3].mxu0 }
 0x179   : > { %v1295_v53 = vadd.f32 %v1294_v52, %v1293_v51 }
 0x17b   : > { %v1296_v54 = vpop.f32.mrb[4].mxu0 }
 0x17c   : > { %v1297_v55 = vpop.f32.mrb[5].mxu0 }
 0x17d   : > { %v1298_v56 = vadd.f32 %v1297_v55, %v1296_v54 }
 0x17f   : > { %v1299_v57 = vpop.f32.mrb[6].mxu0 }
 0x180   : > { %v1300_v58 = vpop.f32.mrb[7].mxu0 }
 0x181   : > { %v1301_v59 = vadd.f32 %v1300_v58, %v1299_v57  ;;  %v309_v57 = vld [vmem:[#allocation2 + $0x38] sm:$0xff] }
 0x183   : > { %v1302_v60 = vpop.f32.mrb[8].mxu0 }
 0x184   : > { %v1303_v61 = vpop.f32.mrb[9].mxu0 }
 0x185   : > { %v1304_v62 = vadd.f32 %v1303_v61, %v1302_v60 }
 0x187   : > { %v1305_v63 = vpop.f32.mrb[10].mxu0 }
 0x188   : > { %v1306_v0 = vpop.f32.mrb[11].mxu0 }
 0x189   : > { %v1307_v1 = vadd.f32 %v1306_v0, %v1305_v63 }
 0x18b   : > { %v1308_v2 = vpop.f32.mrb[12].mxu0 }
 0x18c   : > { %v1309_v3 = vpop.f32.mrb[13].mxu0 }
 0x18d   : > { %v2133_v4 = vadd.f32 %v1309_v3, %v1308_v2  ;;  %v310_v3 = vld [vmem:[#allocation2 + $0x40] sm:$0xff] }
 0x18f   : > { %v1311_v5 = vpop.f32.mrb[14].mxu0 }
 0x190   : > { %v1312_v6 = vpop.f32.mrb[15].mxu0 }
 0x191   : > { %v1313_v7 = vadd.f32 %v1312_v6, %v1311_v5 }
 0x193   : > { %v1314_v8 = vpop.f32.mrb[16].mxu0 }
 0x194   : > { %v1315_v9 = vpop.f32.mrb[17].mxu0 }
 0x195   : > { %v2135_v10 = vadd.f32 %v1315_v9, %v1314_v8  ;;  %v313_v9 = vld [vmem:[#allocation2 + $0x58] sm:$0xff] }
 0x197   : > { %v1317_v11 = vpop.f32.mrb[18].mxu0 }
 0x198   : > { %v1318_v12 = vpop.f32.mrb[19].mxu0 }
 0x199   : > { %v1319_v13 = vadd.f32 %v1318_v12, %v1317_v11  ;;  %v312_v12 = vld [vmem:[#allocation2 + $0x50] sm:$0xff] }
 0x19b   : > { %v1320_v14 = vpop.f32.mrb[20].mxu0 }
 0x19c   : > { %v1321_v15 = vpop.f32.mrb[21].mxu0 }
 0x19d   : > { %v2137_v16 = vadd.f32 %v1321_v15, %v1320_v14 }
 0x19f   : > { %v1323_v17 = vpop.f32.mrb[22].mxu0 }
 0x1a0   : > { %v1324_v18 = vpop.f32.mrb[23].mxu0 }
 0x1a1   : > { %v2139_v19 = vadd.f32 %v1324_v18, %v1323_v17  ;;  %v315_v18 = vld [vmem:[#allocation2 + $0x68] sm:$0xff] }
 0x1a3   : > { %v1326_v20 = vpop.f32.mrb[0].mxu1 }
 0x1a4   : > { %v1327_v21 = vpop.f32.mrb[1].mxu1 }
 0x1a5   : > { %v2141_v22 = vadd.f32 %v1327_v21, %v1326_v20  ;;  %v314_v21 = vld [vmem:[#allocation2 + $0x60] sm:$0xff] }
 0x1a7   : > { %v1329_v23 = vpop.f32.mrb[2].mxu1 }
 0x1a8   : > { %v1330_v24 = vpop.f32.mrb[3].mxu1 }
 0x1a9   : > { %v2143_v25 = vadd.f32 %v1330_v24, %v1329_v23 }
 0x1ab   : > { %v1332_v26 = vpop.f32.mrb[4].mxu1 }
 0x1ac   : > { %v1333_v27 = vpop.f32.mrb[5].mxu1 }
 0x1ad   : > { %v2145_v28 = vadd.f32 %v1333_v27, %v1332_v26  ;;  %v317_v27 = vld [vmem:[#allocation2 + $0x78] sm:$0xff] }
 0x1af   : > { %v1335_v29 = vpop.f32.mrb[6].mxu1 }
 0x1b0   : > { %v1336_v30 = vpop.f32.mrb[7].mxu1 }
 0x1b1   : > { %v2147_v31 = vadd.f32 %v1336_v30, %v1335_v29  ;;  %v316_v30 = vld [vmem:[#allocation2 + $0x70] sm:$0xff] }
 0x1b3   : > { %v1428_v33 = vpop.f32.mrb[8].mxu1 }
 0x1b4   : > { %v684_v34 = vadd.f32 %v1428_v33, %v1295_v53  ;;  %v678_v36 = vpop.f32.mrb[9].mxu1 }
 0x1b5   : > { %v679_v38 = vadd.f32 %v1292_v50, %v678_v36  ;;  %v306_v50 = vld [vmem:[#allocation2 + $0x20] sm:$0xff] }
 0x1b6   : > { %v758_v39 = vadd.f32 %v684_v34, %v303_v32 }
 0x1b7   : > { %v757_v40 = vadd.f32 %v679_v38, %v302_v35  ;;  %v1431_v42 = vpop.f32.mrb[10].mxu1 }
 0x1b8   : > { %775 = vst.msk [vmem:[#allocation2 + $0x8] sm:$0xff] %vm773_vm5, %v758_v39  ;;  %v694_v37 = vadd.f32 %v1431_v42, %v1301_v59  ;;  %v688_v44 = vpop.f32.mrb[11].mxu1 }
 0x1b9   : > { %774 = vst.msk [vmem:[#allocation2] sm:$0xff] %vm773_vm5, %v757_v40  ;;  %v689_v45 = vadd.f32 %v1298_v56, %v688_v44  ;;  %v308_v56 = vld [vmem:[#allocation2 + $0x30] sm:$0xff] }
 0x1ba   : > { %v760_v46 = vadd.f32 %v694_v37, %v305_v41 }
 0x1bb   : > { %v759_v47 = vadd.f32 %v689_v45, %v304_v43  ;;  %v1434_v49 = vpop.f32.mrb[12].mxu1 }
 0x1bc   : > { %777 = vst.msk [vmem:[#allocation2 + $0x18] sm:$0xff] %vm773_vm5, %v760_v46  ;;  %v704_v51 = vadd.f32 %v1434_v49, %v1307_v1  ;;  %v698_v52 = vpop.f32.mrb[13].mxu1  ;;  %v311_v1 = vld [vmem:[#allocation2 + $0x48] sm:$0xff] }
 0x1bd   : > { %776 = vst.msk [vmem:[#allocation2 + $0x10] sm:$0xff] %vm773_vm5, %v759_v47  ;;  %v699_v53 = vadd.f32 %v1304_v62, %v698_v52 }
 0x1be   : > { %v762_v54 = vadd.f32 %v704_v51, %v307_v48 }
 0x1bf   : > { %v761_v55 = vadd.f32 %v699_v53, %v306_v50  ;;  %v1437_v58 = vpop.f32.mrb[14].mxu1 }
 0x1c0   : > { %779 = vst.msk [vmem:[#allocation2 + $0x28] sm:$0xff] %vm773_vm5, %v762_v54  ;;  %v714_v59 = vadd.f32 %v1437_v58, %v1313_v7  ;;  %v708_v60 = vpop.f32.mrb[15].mxu1 }
 0x1c1   : > { %778 = vst.msk [vmem:[#allocation2 + $0x20] sm:$0xff] %vm773_vm5, %v761_v55  ;;  %v709_v61 = vadd.f32 %v2133_v4, %v708_v60 }
 0x1c2   : > { %v764_v63 = vadd.f32 %v714_v59, %v309_v57 }
 0x1c3   : > { %v763_v0 = vadd.f32 %v709_v61, %v308_v56  ;;  %v1440_v2 = vpop.f32.mrb[16].mxu1 }
 0x1c4   : > { %781 = vst.msk [vmem:[#allocation2 + $0x38] sm:$0xff] %vm773_vm5, %v764_v63  ;;  %v724_v62 = vadd.f32 %v1440_v2, %v1319_v13  ;;  %v718_v5 = vpop.f32.mrb[17].mxu1 }
 0x1c5   : > { %780 = vst.msk [vmem:[#allocation2 + $0x30] sm:$0xff] %vm773_vm5, %v763_v0  ;;  %v719_v6 = vadd.f32 %v2135_v10, %v718_v5 }
 0x1c6   : > { %v766_v7 = vadd.f32 %v724_v62, %v311_v1 }
 0x1c7   : > { %v765_v8 = vadd.f32 %v719_v6, %v310_v3  ;;  %v1443_v11 = vpop.f32.mrb[18].mxu1 }
 0x1c8   : > { %783 = vst.msk [vmem:[#allocation2 + $0x48] sm:$0xff] %vm773_vm5, %v766_v7  ;;  %v734_v4 = vadd.f32 %v1443_v11, %v2139_v19  ;;  %v728_v14 = vpop.f32.mrb[19].mxu1 }
 0x1c9   : > { %782 = vst.msk [vmem:[#allocation2 + $0x40] sm:$0xff] %vm773_vm5, %v765_v8  ;;  %v729_v13 = vadd.f32 %v2137_v16, %v728_v14 }
 0x1ca   : > { %v768_v15 = vadd.f32 %v734_v4, %v313_v9 }
 0x1cb   : > { %v767_v17 = vadd.f32 %v729_v13, %v312_v12  ;;  %v1446_v20 = vpop.f32.mrb[20].mxu1 }
 0x1cc   : > { %785 = vst.msk [vmem:[#allocation2 + $0x58] sm:$0xff] %vm773_vm5, %v768_v15  ;;  %v744_v10 = vadd.f32 %v1446_v20, %v2143_v25  ;;  %v738_v23 = vpop.f32.mrb[21].mxu1 }
 0x1cd   : > { %784 = vst.msk [vmem:[#allocation2 + $0x50] sm:$0xff] %vm773_vm5, %v767_v17  ;;  %v739_v19 = vadd.f32 %v2141_v22, %v738_v23 }
 0x1ce   : > { %v770_v24 = vadd.f32 %v744_v10, %v315_v18 }
 0x1cf   : > { %v769_v26 = vadd.f32 %v739_v19, %v314_v21  ;;  %v1449_v29 = vpop.f32.mrb[22].mxu1 }
 0x1d0   : > { %787 = vst.msk [vmem:[#allocation2 + $0x68] sm:$0xff] %vm773_vm5, %v770_v24  ;;  %v754_v16 = vadd.f32 %v1449_v29, %v2147_v31  ;;  %v748_v32 = vpop.f32.mrb[23].mxu1 }
 0x1d1   : > { %786 = vst.msk [vmem:[#allocation2 + $0x60] sm:$0xff] %vm773_vm5, %v769_v26  ;;  %v749_v25 = vadd.f32 %v2145_v28, %v748_v32 }
 0x1d2   : > { %v772_v33 = vadd.f32 %v754_v16, %v317_v27 }
 0x1d3   : > { %v771_v34 = vadd.f32 %v749_v25, %v316_v30 }
 0x1d4   : > { %789 = vst.msk [vmem:[#allocation2 + $0x78] sm:$0xff] %vm773_vm5, %v772_v33 }
 0x1d5   : > { %788 = vst.msk [vmem:[#allocation2 + $0x70] sm:$0xff] %vm773_vm5, %v771_v34 }
 0x1d6 PF: > { %p1252_p6 = scmp.ne.s32.totalorder %s1802_s9, 1 }
 0x1d7   : > { %v794_v22 = vld [vmem:[#allocation2] sm:$0xff] (!%p1252_p6)  ;;  %v795_v35 = vld [vmem:[#allocation2 + $0x8] sm:$0xff] (!%p1252_p6)  ;;  %v796_v36 = vld [vmem:[#allocation2 + $0x10] sm:$0xff] (!%p1252_p6)  ;;  %vm1103_vm6 = vcmask (!%p1252_p6), 523264   ;;  %vm1141_vm7 = vcmask (!%p1252_p6), 519168  }
 0x1d8   : > { %793 = sbr.rel (%p1252_p6) target bundleno = 756 (0x2f4), region = 40  ;;  %v1585_v31 = vpack.c.bf16 (!%p1252_p6), %v795_v35, %v794_v22  ;;  %v797_v38 = vld [vmem:[#allocation2 + $0x18] sm:$0xff] (!%p1252_p6)  ;;  %v798_v40 = vld [vmem:[#allocation2 + $0x20] sm:$0xff] (!%p1252_p6)  ;;  %v799_v41 = vld [vmem:[#allocation2 + $0x28] sm:$0xff] (!%p1252_p6) }
 0x1d9   : > { %v1589_v39 = vpack.c.bf16 (!%p1252_p6), %v797_v38, %v796_v36  ;;  %v1593_v28 = vpack.c.bf16 (!%p1252_p6), %v799_v41, %v798_v40  ;;  %v810_v42 = vld [vmem:[%s2448_s0] sm:$0xff] (!%p1252_p6)  ;;  %v800_v37 = vld [vmem:[#allocation2 + $0x30] sm:$0xff] (!%p1252_p6)  ;;  %v801_v43 = vld [vmem:[#allocation2 + $0x38] sm:$0xff] (!%p1252_p6) }
 0x1da   : > { %1586 = vmatprep.subr.bf16.mxu0 (!%p1252_p6), %v1585_v31  ;;  %1633 = vmatprep.subr.bf16.mxu1 (!%p1252_p6), %v1585_v31  ;;  %v830_v44 = vld [vmem:[%s2448_s0 + $0xa0] sm:$0xff] (!%p1252_p6)  ;;  %v1597_v45 = vpack.c.bf16 (!%p1252_p6), %v801_v43, %v800_v37  ;;  %v803_v47 = vld [vmem:[#allocation2 + $0x48] sm:$0xff] (!%p1252_p6)  ;;  %v804_v49 = vld [vmem:[#allocation2 + $0x50] sm:$0xff] (!%p1252_p6) }
 0x1db   : > { %1588 = vmatpush3.bf16.msra.mxu0 (!%p1252_p6), %v1585_v31  ;;  %1641 = vmatpush3.bf16.msra.mxu1 (!%p1252_p6), %v1585_v31  ;;  %v802_v46 = vld [vmem:[#allocation2 + $0x40] sm:$0xff] (!%p1252_p6)  ;;  %v805_v51 = vld [vmem:[#allocation2 + $0x58] sm:$0xff] (!%p1252_p6)  ;;  %v807_v53 = vld [vmem:[#allocation2 + $0x68] sm:$0xff] (!%p1252_p6) }
 0x1dc   : > { %1590 = vmatprep.subr.bf16.mxu0 (!%p1252_p6), %v1589_v39  ;;  %1634 = vmatprep.subr.bf16.mxu1 (!%p1252_p6), %v1589_v39  ;;  %v1601_v48 = vpack.c.bf16 (!%p1252_p6), %v803_v47, %v802_v46  ;;  %v1605_v50 = vpack.c.bf16 (!%p1252_p6), %v805_v51, %v804_v49  ;;  %v806_v52 = vld [vmem:[#allocation2 + $0x60] sm:$0xff] (!%p1252_p6)  ;;  %v808_v55 = vld [vmem:[#allocation2 + $0x70] sm:$0xff] (!%p1252_p6)  ;;  %v809_v57 = vld [vmem:[#allocation2 + $0x78] sm:$0xff] (!%p1252_p6) }
 0x1dd   : > { %1482 = vmatprep.mubr.f32.mxu0 (!%p1252_p6), %v810_v42  ;;  %1512 = vmatprep.mubr.f32.mxu1 (!%p1252_p6), %v830_v44  ;;  %v1609_v54 = vpack.c.bf16 (!%p1252_p6), %v807_v53, %v806_v52  ;;  %v1613_v58 = vpack.c.bf16 (!%p1252_p6), %v809_v57, %v808_v55  ;;  %v811_v59 = vld [vmem:[%s2448_s0 + $0x8] sm:$0xff] (!%p1252_p6)  ;;  %v812_v60 = vld [vmem:[%s2448_s0 + $0x10] sm:$0xff] (!%p1252_p6)  ;;  %v813_v63 = vld [vmem:[%s2448_s0 + $0x18] sm:$0xff] (!%p1252_p6) }
 0x1de   : > { %v831_v56 = vld [vmem:[%s2448_s0 + $0xa8] sm:$0xff] (!%p1252_p6)  ;;  %v832_v61 = vld [vmem:[%s2448_s0 + $0xb0] sm:$0xff] (!%p1252_p6)  ;;  %v833_v0 = vld [vmem:[%s2448_s0 + $0xb8] sm:$0xff] (!%p1252_p6) }
 0x1df   : > { %1592 = vmatpush3.bf16.msra.mxu0 %v1589_v39  ;;  %1642 = vmatpush3.bf16.msra.mxu1 %v1589_v39  ;;  %v814_v1 = vld [vmem:[%s2448_s0 + $0x20] sm:$0xff]  ;;  %v815_v62 = vld [vmem:[%s2448_s0 + $0x28] sm:$0xff]  ;;  %v816_v5 = vld [vmem:[%s2448_s0 + $0x30] sm:$0xff] }
 0x1e0   : > { %1594 = vmatprep.subr.bf16.mxu0 %v1593_v28  ;;  %1635 = vmatprep.subr.bf16.mxu1 %v1593_v28  ;;  %v834_v2 = vld [vmem:[%s2448_s0 + $0xc0] sm:$0xff]  ;;  %v835_v3 = vld [vmem:[%s2448_s0 + $0xc8] sm:$0xff]  ;;  %v836_v6 = vld [vmem:[%s2448_s0 + $0xd0] sm:$0xff] }
 0x1e1   : > { %v817_v7 = vld [vmem:[%s2448_s0 + $0x38] sm:$0xff]  ;;  %v818_v9 = vld [vmem:[%s2448_s0 + $0x40] sm:$0xff]  ;;  %v819_v4 = vld [vmem:[%s2448_s0 + $0x48] sm:$0xff] }
 0x1e2   : > { %v837_v8 = vld [vmem:[%s2448_s0 + $0xd8] sm:$0xff]  ;;  %v838_v11 = vld [vmem:[%s2448_s0 + $0xe0] sm:$0xff]  ;;  %v839_v12 = vld [vmem:[%s2448_s0 + $0xe8] sm:$0xff] }
 0x1e3   : > { %1596 = vmatpush3.bf16.msra.mxu0 %v1593_v28  ;;  %1643 = vmatpush3.bf16.msra.mxu1 %v1593_v28  ;;  %v820_v14 = vld [vmem:[%s2448_s0 + $0x50] sm:$0xff]  ;;  %v821_v15 = vld [vmem:[%s2448_s0 + $0x58] sm:$0xff]  ;;  %v822_v18 = vld [vmem:[%s2448_s0 + $0x60] sm:$0xff] }
 0x1e4   : > { %1598 = vmatprep.subr.bf16.mxu0 %v1597_v45  ;;  %1636 = vmatprep.subr.bf16.mxu1 %v1597_v45  ;;  %v840_v13 = vld [vmem:[%s2448_s0 + $0xf0] sm:$0xff]  ;;  %v841_v17 = vld [vmem:[%s2448_s0 + $0xf8] sm:$0xff]  ;;  %v842_v20 = vld [vmem:[%s2448_s0 + $0x100] sm:$0xff] }
 0x1e5   : > { %v823_v10 = vld [vmem:[%s2448_s0 + $0x68] sm:$0xff]  ;;  %v824_v23 = vld [vmem:[%s2448_s0 + $0x70] sm:$0xff]  ;;  %v825_v24 = vld [vmem:[%s2448_s0 + $0x78] sm:$0xff] }
 0x1e6   : > { %v843_v21 = vld [vmem:[%s2448_s0 + $0x108] sm:$0xff]  ;;  %v844_v19 = vld [vmem:[%s2448_s0 + $0x110] sm:$0xff]  ;;  %v845_v26 = vld [vmem:[%s2448_s0 + $0x118] sm:$0xff] }
 0x1e7   : > { %1600 = vmatpush3.bf16.msra.mxu0 %v1597_v45  ;;  %1644 = vmatpush3.bf16.msra.mxu1 %v1597_v45  ;;  %v826_v27 = vld [vmem:[%s2448_s0 + $0x80] sm:$0xff]  ;;  %v827_v16 = vld [vmem:[%s2448_s0 + $0x88] sm:$0xff]  ;;  %v828_v32 = vld [vmem:[%s2448_s0 + $0x90] sm:$0xff] }
 0x1e8   : > { %1602 = vmatprep.subr.bf16.mxu0 %v1601_v48  ;;  %1637 = vmatprep.subr.bf16.mxu1 %v1601_v48  ;;  %v846_v29 = vld [vmem:[%s2448_s0 + $0x120] sm:$0xff]  ;;  %v847_v30 = vld [vmem:[%s2448_s0 + $0x128] sm:$0xf]  ;;  %v829_v25 = vld [vmem:[%s2448_s0 + $0x98] sm:$0xff] }
 0x1eb   : > { %1604 = vmatpush3.bf16.msra.mxu0 %v1601_v48  ;;  %1645 = vmatpush3.bf16.msra.mxu1 %v1601_v48 }
 0x1ec   : > { %1606 = vmatprep.subr.bf16.mxu0 %v1605_v50  ;;  %1638 = vmatprep.subr.bf16.mxu1 %v1605_v50 }
 0x1ef   : > { %1608 = vmatpush3.bf16.msra.mxu0 %v1605_v50  ;;  %1646 = vmatpush3.bf16.msra.mxu1 %v1605_v50 }
 0x1f0   : > { %1610 = vmatprep.subr.bf16.mxu0 %v1609_v54  ;;  %1639 = vmatprep.subr.bf16.mxu1 %v1609_v54 }
 0x1f3   : > { %1612 = vmatpush3.bf16.msra.mxu0 %v1609_v54  ;;  %1647 = vmatpush3.bf16.msra.mxu1 %v1609_v54 }
 0x1f4   : > { %1614 = vmatprep.subr.bf16.mxu0 %v1613_v58  ;;  %1640 = vmatprep.subr.bf16.mxu1 %v1613_v58 }
 0x1f7   : > { %1616 = vmatpush3.bf16.msra.mxu0 %v1613_v58  ;;  %1648 = vmatpush3.bf16.msra.mxu1 %v1613_v58 }
 0x1fa   : > { %1483 = vmatmul.mubr.f32.vlgmr.msra.gmra.mrb[0].mxu0 %v811_v59  ;;  %1513 = vmatmul.mubr.f32.vlgmr.msra.gmra.mrb[0].mxu1 %v831_v56 }
 0x1fb   : > { %1485 = vmatprep.mubr.f32.mxu0 %v812_v60  ;;  %1515 = vmatprep.mubr.f32.mxu1 %v832_v61 }
 0x1fe   : > { %1486 = vmatmul.mubr.f32.gmra.mrb[2].mxu0 %v813_v63  ;;  %1516 = vmatmul.mubr.f32.gmra.mrb[2].mxu1 %v833_v0 }
 0x1ff   : > { %1488 = vmatprep.mubr.f32.mxu0 %v814_v1  ;;  %1518 = vmatprep.mubr.f32.mxu1 %v834_v2 }
 0x202   : > { %1489 = vmatmul.mubr.f32.gmra.mrb[4].mxu0 %v815_v62  ;;  %1519 = vmatmul.mubr.f32.gmra.mrb[4].mxu1 %v835_v3 }
 0x203   : > { %1491 = vmatprep.mubr.f32.mxu0 %v816_v5  ;;  %1521 = vmatprep.mubr.f32.mxu1 %v836_v6 }
 0x206   : > { %1492 = vmatmul.mubr.f32.gmra.mrb[6].mxu0 %v817_v7  ;;  %1522 = vmatmul.mubr.f32.gmra.mrb[6].mxu1 %v837_v8 }
 0x207   : > { %1494 = vmatprep.mubr.f32.mxu0 %v818_v9  ;;  %1524 = vmatprep.mubr.f32.mxu1 %v838_v11 }
 0x20a   : > { %1495 = vmatmul.mubr.f32.gmra.mrb[8].mxu0 %v819_v4  ;;  %1525 = vmatmul.mubr.f32.gmra.mrb[8].mxu1 %v839_v12 }
 0x20b   : > { %1497 = vmatprep.mubr.f32.mxu0 %v820_v14  ;;  %1527 = vmatprep.mubr.f32.mxu1 %v840_v13 }
 0x20e   : > { %1498 = vmatmul.mubr.f32.gmra.mrb[10].mxu0 %v821_v15  ;;  %1528 = vmatmul.mubr.f32.gmra.mrb[10].mxu1 %v841_v17 }
 0x20f   : > { %1500 = vmatprep.mubr.f32.mxu0 %v822_v18  ;;  %1530 = vmatprep.mubr.f32.mxu1 %v842_v20 }
 0x212   : > { %1501 = vmatmul.mubr.f32.gmra.mrb[12].mxu0 %v823_v10  ;;  %1531 = vmatmul.mubr.f32.gmra.mrb[12].mxu1 %v843_v21 }
 0x213   : > { %1503 = vmatprep.mubr.f32.mxu0 %v824_v23  ;;  %1533 = vmatprep.mubr.f32.mxu1 %v844_v19 }
 0x216   : > { %1504 = vmatmul.mubr.f32.gmra.mrb[14].mxu0 %v825_v24  ;;  %1534 = vmatmul.mubr.f32.gmra.mrb[14].mxu1 %v845_v26 }
 0x217   : > { %1506 = vmatprep.mubr.f32.mxu0 %v826_v27  ;;  %1536 = vmatprep.mubr.f32.mxu1 %v846_v29 }
 0x21a   : > { %1507 = vmatmul.mubr.f32.gmra.mrb[16].mxu0 %v827_v16  ;;  %1537 = vmatmul.mubr.f32.gmra.mrb[16].mxu1 %v847_v30 }
 0x21b   : > { %1509 = vmatprep.mubr.f32.mxu0 %v828_v32 }
 0x21e   : > { %1510 = vmatmul.mubr.f32.gmra.mrb[18].mxu0 %v829_v25 }
 0x2cd   : > { %v1484_v33 = vpop.f32.mrb[0].mxu0  ;;  %v1514_v34 = vpop.f32.mrb[0].mxu1 }
 0x2ce   : > { %1105 = vst.msk [vmem:[%s2450_s2 + $0x8] sm:$0xff] %vm1103_vm6, %v1484_v33  ;;  %v914_v22 = vpop.f32.mrb[1].mxu0  ;;  %1125 = vst.msk [vmem:[%s2450_s2 + $0xa8] sm:$0xff] %vm1103_vm6, %v1514_v34  ;;  %v1014_v35 = vpop.f32.mrb[1].mxu1 }
 0x2cf   : > { %1104 = vst.msk [vmem:[%s2450_s2] sm:$0xff] %vm1103_vm6, %v914_v22  ;;  %1124 = vst.msk [vmem:[%s2450_s2 + $0xa0] sm:$0xff] %vm1103_vm6, %v1014_v35 }
 0x2d1   : > { %v1487_v36 = vpop.f32.mrb[2].mxu0  ;;  %v1517_v31 = vpop.f32.mrb[2].mxu1 }
 0x2d2   : > { %1107 = vst.msk [vmem:[%s2450_s2 + $0x18] sm:$0xff] %vm1103_vm6, %v1487_v36  ;;  %v924_v38 = vpop.f32.mrb[3].mxu0  ;;  %1127 = vst.msk [vmem:[%s2450_s2 + $0xb8] sm:$0xff] %vm1103_vm6, %v1517_v31  ;;  %v1024_v39 = vpop.f32.mrb[3].mxu1 }
 0x2d3   : > { %1106 = vst.msk [vmem:[%s2450_s2 + $0x10] sm:$0xff] %vm1103_vm6, %v924_v38  ;;  %1126 = vst.msk [vmem:[%s2450_s2 + $0xb0] sm:$0xff] %vm1103_vm6, %v1024_v39 }
 0x2d5   : > { %v1490_v40 = vpop.f32.mrb[4].mxu0  ;;  %v1520_v41 = vpop.f32.mrb[4].mxu1 }
 0x2d6   : > { %1109 = vst.msk [vmem:[%s2450_s2 + $0x28] sm:$0xff] %vm1103_vm6, %v1490_v40  ;;  %v934_v28 = vpop.f32.mrb[5].mxu0  ;;  %1129 = vst.msk [vmem:[%s2450_s2 + $0xc8] sm:$0xff] %vm1103_vm6, %v1520_v41  ;;  %v1034_v42 = vpop.f32.mrb[5].mxu1 }
 0x2d7   : > { %1108 = vst.msk [vmem:[%s2450_s2 + $0x20] sm:$0xff] %vm1103_vm6, %v934_v28  ;;  %1128 = vst.msk [vmem:[%s2450_s2 + $0xc0] sm:$0xff] %vm1103_vm6, %v1034_v42 }
 0x2d9   : > { %v1493_v37 = vpop.f32.mrb[6].mxu0  ;;  %v1523_v43 = vpop.f32.mrb[6].mxu1 }
 0x2da   : > { %1111 = vst.msk [vmem:[%s2450_s2 + $0x38] sm:$0xff] %vm1103_vm6, %v1493_v37  ;;  %v944_v44 = vpop.f32.mrb[7].mxu0  ;;  %1131 = vst.msk [vmem:[%s2450_s2 + $0xd8] sm:$0xff] %vm1103_vm6, %v1523_v43  ;;  %v1044_v45 = vpop.f32.mrb[7].mxu1 }
 0x2db   : > { %1110 = vst.msk [vmem:[%s2450_s2 + $0x30] sm:$0xff] %vm1103_vm6, %v944_v44  ;;  %1130 = vst.msk [vmem:[%s2450_s2 + $0xd0] sm:$0xff] %vm1103_vm6, %v1044_v45 }
 0x2dd   : > { %v1496_v46 = vpop.f32.mrb[8].mxu0  ;;  %v1526_v47 = vpop.f32.mrb[8].mxu1 }
 0x2de   : > { %1113 = vst.msk [vmem:[%s2450_s2 + $0x48] sm:$0xff] %vm1103_vm6, %v1496_v46  ;;  %v954_v48 = vpop.f32.mrb[9].mxu0  ;;  %1133 = vst.msk [vmem:[%s2450_s2 + $0xe8] sm:$0xff] %vm1103_vm6, %v1526_v47  ;;  %v1054_v49 = vpop.f32.mrb[9].mxu1 }
 0x2df   : > { %1112 = vst.msk [vmem:[%s2450_s2 + $0x40] sm:$0xff] %vm1103_vm6, %v954_v48  ;;  %1132 = vst.msk [vmem:[%s2450_s2 + $0xe0] sm:$0xff] %vm1103_vm6, %v1054_v49 }
 0x2e1   : > { %v1499_v51 = vpop.f32.mrb[10].mxu0  ;;  %v1529_v50 = vpop.f32.mrb[10].mxu1 }
 0x2e2   : > { %1115 = vst.msk [vmem:[%s2450_s2 + $0x58] sm:$0xff] %vm1103_vm6, %v1499_v51  ;;  %v964_v52 = vpop.f32.mrb[11].mxu0  ;;  %1135 = vst.msk [vmem:[%s2450_s2 + $0xf8] sm:$0xff] %vm1103_vm6, %v1529_v50  ;;  %v1064_v53 = vpop.f32.mrb[11].mxu1 }
 0x2e3   : > { %1114 = vst.msk [vmem:[%s2450_s2 + $0x50] sm:$0xff] %vm1103_vm6, %v964_v52  ;;  %1134 = vst.msk [vmem:[%s2450_s2 + $0xf0] sm:$0xff] %vm1103_vm6, %v1064_v53 }
 0x2e5   : > { %v1502_v54 = vpop.f32.mrb[12].mxu0  ;;  %v1532_v55 = vpop.f32.mrb[12].mxu1 }
 0x2e6   : > { %1117 = vst.msk [vmem:[%s2450_s2 + $0x68] sm:$0xff] %vm1103_vm6, %v1502_v54  ;;  %v974_v57 = vpop.f32.mrb[13].mxu0  ;;  %1137 = vst.msk [vmem:[%s2450_s2 + $0x108] sm:$0xff] %vm1103_vm6, %v1532_v55  ;;  %v1074_v58 = vpop.f32.mrb[13].mxu1 }
 0x2e7   : > { %1116 = vst.msk [vmem:[%s2450_s2 + $0x60] sm:$0xff] %vm1103_vm6, %v974_v57  ;;  %1136 = vst.msk [vmem:[%s2450_s2 + $0x100] sm:$0xff] %vm1103_vm6, %v1074_v58 }
 0x2e9   : > { %v1505_v59 = vpop.f32.mrb[14].mxu0  ;;  %v1535_v56 = vpop.f32.mrb[14].mxu1 }
 0x2ea   : > { %1119 = vst.msk [vmem:[%s2450_s2 + $0x78] sm:$0xff] %vm1103_vm6, %v1505_v59  ;;  %v984_v60 = vpop.f32.mrb[15].mxu0  ;;  %1139 = vst.msk [vmem:[%s2450_s2 + $0x118] sm:$0xff] %vm1103_vm6, %v1535_v56  ;;  %v1084_v61 = vpop.f32.mrb[15].mxu1 }
 0x2eb   : > { %1118 = vst.msk [vmem:[%s2450_s2 + $0x70] sm:$0xff] %vm1103_vm6, %v984_v60  ;;  %1138 = vst.msk [vmem:[%s2450_s2 + $0x110] sm:$0xff] %vm1103_vm6, %v1084_v61 }
 0x2ed   : > { %v1508_v63 = vpop.f32.mrb[16].mxu0  ;;  %v1538_v0 = vpop.f32.mrb[16].mxu1 }
 0x2ee   : > { %1121 = vst.msk [vmem:[%s2450_s2 + $0x88] sm:$0xff] %vm1103_vm6, %v1508_v63  ;;  %v994_v1 = vpop.f32.mrb[17].mxu0  ;;  %v1094_v2 = vpop.f32.mrb[17].mxu1 }
 0x2ef   : > { %1142 = vst.msk [vmem:[%s2450_s2 + $0x128] sm:$0xf] %vm1141_vm7, %v1538_v0 }
 0x2f0   : > { %1120 = vst.msk [vmem:[%s2450_s2 + $0x80] sm:$0xff] %vm1103_vm6, %v994_v1  ;;  %1140 = vst.msk [vmem:[%s2450_s2 + $0x120] sm:$0xff] %vm1103_vm6, %v1094_v2 }
 0x2f1   : > { %v1511_v62 = vpop.f32.mrb[18].mxu0 }
 0x2f2   : > { %1123 = vst.msk [vmem:[%s2450_s2 + $0x98] sm:$0xff] %vm1103_vm6, %v1511_v62  ;;  %v1004_v3 = vpop.f32.mrb[19].mxu0 }
 0x2f3   : > { %1122 = vst.msk [vmem:[%s2450_s2 + $0x90] sm:$0xff] %vm1103_vm6, %v1004_v3 }
 0x2f4 PF: > { %s12_s11 = sadd.s32 1, %s1810_s11   ;;  %s2451_s9 = smov %s1806_s10 }
 0x2f5   : > { %p9_p7 = scmp.ge.s32.totalorder %s12_s11, 4   ;;  %s2452_s10 = smov %s2454_s12 }
 0x2f7   :  { %11 = sbr.rel (!%p9_p7) target bundleno = 2 (0x2), region = 73 }

</bundles_post_ra>
